<compile_context>
chip_gen: v6e
topology: v6e:2x2x1
jax: 0.10.0
libtpu: 0.0.40
codegen_flags: <defaults>
</compile_context>

<pallas_src>
import jax
import jax.numpy as jnp
from jax.experimental import pallas as pl
from jax.experimental.pallas import tpu as pltpu

EPS = 1e-5  # nn.BatchNorm2d default eps


def _banded_weights(w_oihw, width, dtype=jnp.bfloat16):
    """PyTorch (Cout, Cin, 3, 3) conv weight -> (3*W*Cin, W*Cout) banded matrix.

    The contraction axis is kh-major: block kh pairs with the row-shifted
    activations [x_prev | x | x_next].  Within block kh,
      M[w_in*Cin + ci, w_out*Cout + co] = w[co, ci, kh, w_in - w_out + 1]
    when |w_in - w_out| <= 1, else 0 (the zero band == width-wise zero padding).
    """
    cout, cin, kh_, kw_ = w_oihw.shape
    wt = jnp.transpose(w_oihw, (2, 3, 1, 0))                     # (kh, kw, ci, co)
    w_in = jnp.arange(width)[:, None]
    w_out = jnp.arange(width)[None, :]
    dw = w_in - w_out
    valid = (jnp.abs(dw) <= 1).astype(wt.dtype)                  # (W, W)
    kw_idx = jnp.clip(dw + 1, 0, kw_ - 1)                        # (W, W)
    band = wt[:, kw_idx, :, :] * valid[None, :, :, None, None]   # (kh, Wi, Wo, ci, co)
    band = jnp.transpose(band, (0, 1, 3, 2, 4))                  # (kh, Wi, ci, Wo, co)
    return band.reshape(kh_ * width * cin, width * cout).astype(dtype)


def make_residual_block_kernel(N, C, H, W):
    NH, WC = N * H, W * C
    inv_count = 1.0 / float(N * H * W)          # BN normalizer (biased variance)

    def conv3x3(x, m_ref, tmask, bmask):
        """One fused MXU matmul per conv: (NH, 3*WC) bf16 x (3*WC, WC) bf16."""
        # Row shifts on the sublane axis; shifts are NON-NEGATIVE (cyclic roll
        # by NH-1 == shift of -1), borders zeroed by the masks.
        x_prev = pltpu.roll(x, shift=1, axis=0) * tmask        # row r <- r-1
        x_next = pltpu.roll(x, shift=NH - 1, axis=0) * bmask   # row r <- r+1
        lhs = jnp.concatenate([x_prev, x, x_next], axis=1).astype(jnp.bfloat16)
        return jnp.dot(lhs, m_ref[...], preferred_element_type=jnp.float32)

    def channel_fold(v):
        """Sum a (1, WC) lane vector over the W lanes of each channel and
        broadcast the per-channel result back to every lane.

        lane = w*C + c, so log-step cyclic lane rolls by C, 2C, 4C, ... (XLU)
        accumulate all W width positions of the same channel into every lane.
        """
        shift = C
        while shift < WC:
            v = v + pltpu.roll(v, shift=shift, axis=1)
            shift *= 2
        return v

    def bn_relu(acc, gamma, beta):
        """Training-mode BatchNorm (batch stats, biased var, two-pass) + ReLU."""
        mean = channel_fold(jnp.sum(acc, axis=0, keepdims=True)) * inv_count
        centered = acc - mean
        var = channel_fold(jnp.sum(centered * centered, axis=0,
                                   keepdims=True)) * inv_count
        y = centered * (jax.lax.rsqrt(var + EPS) * gamma) + beta
        return jnp.maximum(y, 0.0)

    def kernel(x_ref, m1_ref, m2_ref, gb_ref, out_ref):
        x = x_ref[...]                                            # (NH, WC) f32
        # Border masks built in-kernel (no operands): zero the row that would
        # wrap across an image boundary after the cyclic roll.
        rows = jax.lax.broadcasted_iota(jnp.int32, (NH, 1), 0) % H
        tmask = (rows != 0).astype(jnp.float32)                   # top row of image
        bmask = (rows != H - 1).astype(jnp.float32)                # bottom row
        gb = gb_ref[...]                                          # (8, WC): g1,b1,g2,b2,pad
        y1 = bn_relu(conv3x3(x, m1_ref, tmask, bmask), gb[0:1, :], gb[1:2, :])
        y2 = bn_relu(conv3x3(y1, m2_ref, tmask, bmask), gb[2:3, :], gb[3:4, :])
        out_ref[...] = y2 + x          # ReLU BEFORE the residual add (module order)

    return kernel


def residual_block(x_nchw, w1, g1, b1, w2, g2, b2):
    """x_nchw: (N, C, H, W) f32; w1/w2: (C, C, 3, 3) PyTorch OIHW; g*/b*: (C,)."""
    N, C, H, W = x_nchw.shape
    WC = W * C
    assert WC % 128 == 0, "lane-dense layout expects W*C to be a multiple of 128"

    # ---- layout plumbing (XLA glue, outside the kernel) ----
    x2d = jnp.transpose(x_nchw, (0, 2, 3, 1)).reshape(N * H, WC)   # lane = w*C + c
    m1 = _banded_weights(w1, W)                  # (3*WC, WC) bf16 MXU operand
    m2 = _banded_weights(w2, W)

    # BN params for both layers packed into one slab (rows: g1, b1, g2, b2),
    # each row tiled across W so it lines up with lane = w*C + c; pad to 8 rows.
    gb = jnp.stack([jnp.tile(g1, W), jnp.tile(b1, W),
                    jnp.tile(g2, W), jnp.tile(b2, W)], axis=0).astype(jnp.float32)
    gb = jnp.pad(gb, ((0, 8 - gb.shape[0]), (0, 0)))               # (8, WC)

    out2d = pl.pallas_call(
        make_residual_block_kernel(N, C, H, W),
        out_shape=jax.ShapeDtypeStruct((N * H, WC), jnp.float32),
        in_specs=[pl.BlockSpec(memory_space=pltpu.MemorySpace.VMEM)] * 4,
        out_specs=pl.BlockSpec(memory_space=pltpu.MemorySpace.VMEM),
        input_output_aliases={0: 0},   # x2d fully read before the single store
    )(x2d, m1, m2, gb)

    return jnp.transpose(out2d.reshape(N, H, W, C), (0, 3, 1, 2))  # back to NCHW


if __name__ == "__main__":
    key = jax.random.PRNGKey(0)
    k1, k2, k3, k4, k5, k6, k7 = jax.random.split(key, 7)

    # ResidualBlock(in_channels=8, out_channels=8, kernel_size=3, padding=1, stride=1)
    N, C, H, W = 2, 8, 16, 16                       # W*C = 128 -> lane-dense
    x = jax.random.normal(k1, (N, C, H, W), jnp.float32)
    w1 = 0.1 * jax.random.normal(k2, (C, C, 3, 3), jnp.float32)   # conv_res1.weight
    w2 = 0.1 * jax.random.normal(k3, (C, C, 3, 3), jnp.float32)   # conv_res2.weight
    g1 = 1.0 + 0.1 * jax.random.normal(k4, (C,), jnp.float32)     # conv_res1_bn.weight
    b1 = 0.1 * jax.random.normal(k5, (C,), jnp.float32)           # conv_res1_bn.bias
    g2 = 1.0 + 0.1 * jax.random.normal(k6, (C,), jnp.float32)     # conv_res2_bn.weight
    b2 = 0.1 * jax.random.normal(k7, (C,), jnp.float32)           # conv_res2_bn.bias

    out = jax.block_until_ready(residual_block(x, w1, g1, b1, w2, g2, b2))

    # Pure-JAX reference (NCHW, training-mode BatchNorm batch statistics).
    # The kernel stores conv weights in bf16 (MXU-native); the reference uses
    # identically rounded weights so the comparison isolates the kernel's
    # activation rounding (bf16 MXU operands, f32 accumulation).
    w1_q = w1.astype(jnp.bfloat16).astype(jnp.float32)
    w2_q = w2.astype(jnp.bfloat16).astype(jnp.float32)

    def bn_relu_ref(y, g, b):
        mu = jnp.mean(y, axis=(0, 2, 3), keepdims=True)
        var = jnp.mean((y - mu) ** 2, axis=(0, 2, 3), keepdims=True)
        yn = (y - mu) * jax.lax.rsqrt(var + EPS) * g.reshape(1, -1, 1, 1) \
             + b.reshape(1, -1, 1, 1)
        return jnp.maximum(yn, 0.0)

    def conv_ref(z, w):
        return jax.lax.conv_general_dilated(
            z, w, window_strides=(1, 1), padding=((1, 1), (1, 1)),
            dimension_numbers=("NCHW", "OIHW", "NCHW"))

    ref = bn_relu_ref(conv_ref(bn_relu_ref(conv_ref(x, w1_q), g1, b1), w2_q),
                      g2, b2) + x

    assert out.shape == (N, C, H, W)
    err = float(jnp.max(jnp.abs(out - ref)))
    assert jnp.allclose(out, ref, atol=2e-2, rtol=2e-2), err
    print("KERNEL_OK")
</pallas_src>

<mosaic_0001>
module attributes {stable_mosaic.version = 11 : i64} {
  func.func @kernel(%arg0: memref<32x128xf32, #tpu.memory_space<vmem>>, %arg1: memref<384x128xbf16, #tpu.memory_space<vmem>>, %arg2: memref<384x128xbf16, #tpu.memory_space<vmem>>, %arg3: memref<8x128xf32, #tpu.memory_space<vmem>>, %arg4: memref<32x128xf32, #tpu.memory_space<vmem>>) attributes {dimension_semantics = [], scalar_prefetch = 0 : i64, scratch_operands = 0 : i64, tpu.core_type = #tpu.core_type<tc>} {
    %c0 = arith.constant 0 : index
    %c0_0 = arith.constant 0 : index
    %0 = vector.load %arg0[%c0, %c0_0] : memref<32x128xf32, #tpu.memory_space<vmem>>, vector<32x128xf32>
    %1 = tpu.iota {dimensions = array<i32: 0>} : vector<32x1xi32>
    %c16_i32 = arith.constant 16 : i32
    %c0_i32 = arith.constant 0 : i32
    %2 = arith.cmpi eq, %c16_i32, %c0_i32 : i32
    %c1_i32 = arith.constant 1 : i32
    %3 = arith.select %2, %c1_i32, %c16_i32 : i32
    %4 = vector.broadcast %3 : i32 to vector<32x1xi32>
    %5 = arith.remsi %1, %4 : vector<32x1xi32>
    %c0_i32_1 = arith.constant 0 : i32
    %6 = vector.broadcast %c0_i32_1 : i32 to vector<32x1xi32>
    %7 = arith.cmpi ne, %5, %6 : vector<32x1xi32>
    %c0_i32_2 = arith.constant 0 : i32
    %8 = vector.broadcast %c0_i32_2 : i32 to vector<32x1xi32>
    %9 = arith.cmpi slt, %5, %8 : vector<32x1xi32>
    %c0_i32_3 = arith.constant 0 : i32
    %10 = arith.cmpi slt, %3, %c0_i32_3 : i32
    %11 = vector.broadcast %10 : i1 to vector<32x1xi1>
    %12 = vector.broadcast %11 : vector<32x1xi1> to vector<32x1xi1>
    %13 = arith.xori %9, %12 : vector<32x1xi1>
    %14 = arith.andi %13, %7 : vector<32x1xi1>
    %15 = vector.broadcast %3 : i32 to vector<32x1xi32>
    %16 = arith.addi %5, %15 : vector<32x1xi32>
    %17 = arith.select %14, %16, %5 : vector<32x1xi1>, vector<32x1xi32>
    %c0_i32_4 = arith.constant 0 : i32
    %18 = vector.broadcast %c0_i32_4 : i32 to vector<32x1xi32>
    %19 = arith.cmpi ne, %17, %18 : vector<32x1xi32>
    %20 = arith.extui %19 : vector<32x1xi1> to vector<32x1xi32>
    %21 = arith.sitofp %20 : vector<32x1xi32> to vector<32x1xf32>
    %c15_i32 = arith.constant 15 : i32
    %22 = vector.broadcast %c15_i32 : i32 to vector<32x1xi32>
    %23 = arith.cmpi ne, %17, %22 : vector<32x1xi32>
    %24 = arith.extui %23 : vector<32x1xi1> to vector<32x1xi32>
    %25 = arith.sitofp %24 : vector<32x1xi32> to vector<32x1xf32>
    %c0_5 = arith.constant 0 : index
    %c0_6 = arith.constant 0 : index
    %26 = vector.load %arg3[%c0_5, %c0_6] : memref<8x128xf32, #tpu.memory_space<vmem>>, vector<8x128xf32>
    %c1_i32_7 = arith.constant 1 : i32
    %27 = tpu.dynamic_rotate %0 by %c1_i32_7 dim 0 : vector<32x128xf32>, i32 -> vector<32x128xf32>
    %28 = vector.broadcast %21 : vector<32x1xf32> to vector<32x128xf32>
    %29 = arith.mulf %27, %28 : vector<32x128xf32>
    %c31_i32 = arith.constant 31 : i32
    %30 = tpu.dynamic_rotate %0 by %c31_i32 dim 0 : vector<32x128xf32>, i32 -> vector<32x128xf32>
    %31 = vector.broadcast %25 : vector<32x1xf32> to vector<32x128xf32>
    %32 = arith.mulf %30, %31 : vector<32x128xf32>
    %33 = tpu.concatenate %29, %0, %32 in 1 : vector<32x128xf32>, vector<32x128xf32>, vector<32x128xf32> -> vector<32x384xf32>
    %34 = arith.truncf %33 : vector<32x384xf32> to vector<32x384xbf16>
    %c0_8 = arith.constant 0 : index
    %c0_9 = arith.constant 0 : index
    %35 = vector.load %arg1[%c0_8, %c0_9] : memref<384x128xbf16, #tpu.memory_space<vmem>>, vector<384x128xbf16>
    %cst = arith.constant dense<0.000000e+00> : vector<32x128xf32>
    %36 = tpu.matmul %34, %35, %cst {dimension_numbers = #tpu.dot_dimension_numbers<[1], [0], [0], [1], [0, 0, 1, 1], [], []>} : vector<32x384xbf16>, vector<384x128xbf16>, vector<32x128xf32> -> vector<32x128xf32>
    %37 = vector.extract_strided_slice %26 {offsets = [0, 0], sizes = [1, 128], strides = [1, 1]} : vector<8x128xf32> to vector<1x128xf32>
    %38 = vector.extract_strided_slice %26 {offsets = [1, 0], sizes = [1, 128], strides = [1, 1]} : vector<8x128xf32> to vector<1x128xf32>
    %cst_10 = arith.constant dense<0.000000e+00> : vector<128xf32>
    %39 = vector.multi_reduction <add>, %36, %cst_10 [0] : vector<32x128xf32> to vector<128xf32>
    %40 = vector.shape_cast %39 : vector<128xf32> to vector<1x128xf32>
    %c8_i32 = arith.constant 8 : i32
    %41 = tpu.dynamic_rotate %40 by %c8_i32 dim 1 : vector<1x128xf32>, i32 -> vector<1x128xf32>
    %42 = arith.addf %40, %41 : vector<1x128xf32>
    %c16_i32_11 = arith.constant 16 : i32
    %43 = tpu.dynamic_rotate %42 by %c16_i32_11 dim 1 : vector<1x128xf32>, i32 -> vector<1x128xf32>
    %44 = arith.addf %42, %43 : vector<1x128xf32>
    %c32_i32 = arith.constant 32 : i32
    %45 = tpu.dynamic_rotate %44 by %c32_i32 dim 1 : vector<1x128xf32>, i32 -> vector<1x128xf32>
    %46 = arith.addf %44, %45 : vector<1x128xf32>
    %c64_i32 = arith.constant 64 : i32
    %47 = tpu.dynamic_rotate %46 by %c64_i32 dim 1 : vector<1x128xf32>, i32 -> vector<1x128xf32>
    %48 = arith.addf %46, %47 : vector<1x128xf32>
    %cst_12 = arith.constant 0.001953125 : f32
    %49 = vector.broadcast %cst_12 : f32 to vector<1x128xf32>
    %50 = arith.mulf %48, %49 : vector<1x128xf32>
    %51 = vector.broadcast %50 : vector<1x128xf32> to vector<32x128xf32>
    %52 = arith.subf %36, %51 : vector<32x128xf32>
    %53 = arith.mulf %52, %52 : vector<32x128xf32>
    %cst_13 = arith.constant dense<0.000000e+00> : vector<128xf32>
    %54 = vector.multi_reduction <add>, %53, %cst_13 [0] : vector<32x128xf32> to vector<128xf32>
    %55 = vector.shape_cast %54 : vector<128xf32> to vector<1x128xf32>
    %c8_i32_14 = arith.constant 8 : i32
    %56 = tpu.dynamic_rotate %55 by %c8_i32_14 dim 1 : vector<1x128xf32>, i32 -> vector<1x128xf32>
    %57 = arith.addf %55, %56 : vector<1x128xf32>
    %c16_i32_15 = arith.constant 16 : i32
    %58 = tpu.dynamic_rotate %57 by %c16_i32_15 dim 1 : vector<1x128xf32>, i32 -> vector<1x128xf32>
    %59 = arith.addf %57, %58 : vector<1x128xf32>
    %c32_i32_16 = arith.constant 32 : i32
    %60 = tpu.dynamic_rotate %59 by %c32_i32_16 dim 1 : vector<1x128xf32>, i32 -> vector<1x128xf32>
    %61 = arith.addf %59, %60 : vector<1x128xf32>
    %c64_i32_17 = arith.constant 64 : i32
    %62 = tpu.dynamic_rotate %61 by %c64_i32_17 dim 1 : vector<1x128xf32>, i32 -> vector<1x128xf32>
    %63 = arith.addf %61, %62 : vector<1x128xf32>
    %cst_18 = arith.constant 0.001953125 : f32
    %64 = vector.broadcast %cst_18 : f32 to vector<1x128xf32>
    %65 = arith.mulf %63, %64 : vector<1x128xf32>
    %cst_19 = arith.constant 9.99999974E-6 : f32
    %66 = vector.broadcast %cst_19 : f32 to vector<1x128xf32>
    %67 = arith.addf %65, %66 : vector<1x128xf32>
    %68 = math.rsqrt %67 : vector<1x128xf32>
    %69 = arith.mulf %68, %37 : vector<1x128xf32>
    %70 = vector.broadcast %69 : vector<1x128xf32> to vector<32x128xf32>
    %71 = arith.mulf %52, %70 : vector<32x128xf32>
    %72 = vector.broadcast %38 : vector<1x128xf32> to vector<32x128xf32>
    %73 = arith.addf %71, %72 : vector<32x128xf32>
    %cst_20 = arith.constant 0.000000e+00 : f32
    %74 = vector.broadcast %cst_20 : f32 to vector<32x128xf32>
    %75 = arith.maximumf %73, %74 : vector<32x128xf32>
    %c1_i32_21 = arith.constant 1 : i32
    %76 = tpu.dynamic_rotate %75 by %c1_i32_21 dim 0 : vector<32x128xf32>, i32 -> vector<32x128xf32>
    %77 = vector.broadcast %21 : vector<32x1xf32> to vector<32x128xf32>
    %78 = arith.mulf %76, %77 : vector<32x128xf32>
    %c31_i32_22 = arith.constant 31 : i32
    %79 = tpu.dynamic_rotate %75 by %c31_i32_22 dim 0 : vector<32x128xf32>, i32 -> vector<32x128xf32>
    %80 = vector.broadcast %25 : vector<32x1xf32> to vector<32x128xf32>
    %81 = arith.mulf %79, %80 : vector<32x128xf32>
    %82 = tpu.concatenate %78, %75, %81 in 1 : vector<32x128xf32>, vector<32x128xf32>, vector<32x128xf32> -> vector<32x384xf32>
    %83 = arith.truncf %82 : vector<32x384xf32> to vector<32x384xbf16>
    %c0_23 = arith.constant 0 : index
    %c0_24 = arith.constant 0 : index
    %84 = vector.load %arg2[%c0_23, %c0_24] : memref<384x128xbf16, #tpu.memory_space<vmem>>, vector<384x128xbf16>
    %cst_25 = arith.constant dense<0.000000e+00> : vector<32x128xf32>
    %85 = tpu.matmul %83, %84, %cst_25 {dimension_numbers = #tpu.dot_dimension_numbers<[1], [0], [0], [1], [0, 0, 1, 1], [], []>} : vector<32x384xbf16>, vector<384x128xbf16>, vector<32x128xf32> -> vector<32x128xf32>
    %86 = vector.extract_strided_slice %26 {offsets = [2, 0], sizes = [1, 128], strides = [1, 1]} : vector<8x128xf32> to vector<1x128xf32>
    %87 = vector.extract_strided_slice %26 {offsets = [3, 0], sizes = [1, 128], strides = [1, 1]} : vector<8x128xf32> to vector<1x128xf32>
    %cst_26 = arith.constant dense<0.000000e+00> : vector<128xf32>
    %88 = vector.multi_reduction <add>, %85, %cst_26 [0] : vector<32x128xf32> to vector<128xf32>
    %89 = vector.shape_cast %88 : vector<128xf32> to vector<1x128xf32>
    %c8_i32_27 = arith.constant 8 : i32
    %90 = tpu.dynamic_rotate %89 by %c8_i32_27 dim 1 : vector<1x128xf32>, i32 -> vector<1x128xf32>
    %91 = arith.addf %89, %90 : vector<1x128xf32>
    %c16_i32_28 = arith.constant 16 : i32
    %92 = tpu.dynamic_rotate %91 by %c16_i32_28 dim 1 : vector<1x128xf32>, i32 -> vector<1x128xf32>
    %93 = arith.addf %91, %92 : vector<1x128xf32>
    %c32_i32_29 = arith.constant 32 : i32
    %94 = tpu.dynamic_rotate %93 by %c32_i32_29 dim 1 : vector<1x128xf32>, i32 -> vector<1x128xf32>
    %95 = arith.addf %93, %94 : vector<1x128xf32>
    %c64_i32_30 = arith.constant 64 : i32
    %96 = tpu.dynamic_rotate %95 by %c64_i32_30 dim 1 : vector<1x128xf32>, i32 -> vector<1x128xf32>
    %97 = arith.addf %95, %96 : vector<1x128xf32>
    %cst_31 = arith.constant 0.001953125 : f32
    %98 = vector.broadcast %cst_31 : f32 to vector<1x128xf32>
    %99 = arith.mulf %97, %98 : vector<1x128xf32>
    %100 = vector.broadcast %99 : vector<1x128xf32> to vector<32x128xf32>
    %101 = arith.subf %85, %100 : vector<32x128xf32>
    %102 = arith.mulf %101, %101 : vector<32x128xf32>
    %cst_32 = arith.constant dense<0.000000e+00> : vector<128xf32>
    %103 = vector.multi_reduction <add>, %102, %cst_32 [0] : vector<32x128xf32> to vector<128xf32>
    %104 = vector.shape_cast %103 : vector<128xf32> to vector<1x128xf32>
    %c8_i32_33 = arith.constant 8 : i32
    %105 = tpu.dynamic_rotate %104 by %c8_i32_33 dim 1 : vector<1x128xf32>, i32 -> vector<1x128xf32>
    %106 = arith.addf %104, %105 : vector<1x128xf32>
    %c16_i32_34 = arith.constant 16 : i32
    %107 = tpu.dynamic_rotate %106 by %c16_i32_34 dim 1 : vector<1x128xf32>, i32 -> vector<1x128xf32>
    %108 = arith.addf %106, %107 : vector<1x128xf32>
    %c32_i32_35 = arith.constant 32 : i32
    %109 = tpu.dynamic_rotate %108 by %c32_i32_35 dim 1 : vector<1x128xf32>, i32 -> vector<1x128xf32>
    %110 = arith.addf %108, %109 : vector<1x128xf32>
    %c64_i32_36 = arith.constant 64 : i32
    %111 = tpu.dynamic_rotate %110 by %c64_i32_36 dim 1 : vector<1x128xf32>, i32 -> vector<1x128xf32>
    %112 = arith.addf %110, %111 : vector<1x128xf32>
    %cst_37 = arith.constant 0.001953125 : f32
    %113 = vector.broadcast %cst_37 : f32 to vector<1x128xf32>
    %114 = arith.mulf %112, %113 : vector<1x128xf32>
    %cst_38 = arith.constant 9.99999974E-6 : f32
    %115 = vector.broadcast %cst_38 : f32 to vector<1x128xf32>
    %116 = arith.addf %114, %115 : vector<1x128xf32>
    %117 = math.rsqrt %116 : vector<1x128xf32>
    %118 = arith.mulf %117, %86 : vector<1x128xf32>
    %119 = vector.broadcast %118 : vector<1x128xf32> to vector<32x128xf32>
    %120 = arith.mulf %101, %119 : vector<32x128xf32>
    %121 = vector.broadcast %87 : vector<1x128xf32> to vector<32x128xf32>
    %122 = arith.addf %120, %121 : vector<32x128xf32>
    %cst_39 = arith.constant 0.000000e+00 : f32
    %123 = vector.broadcast %cst_39 : f32 to vector<32x128xf32>
    %124 = arith.maximumf %122, %123 : vector<32x128xf32>
    %125 = arith.addf %124, %0 : vector<32x128xf32>
    %c0_40 = arith.constant 0 : index
    %c0_41 = arith.constant 0 : index
    %126 = vector.load %arg4[%c0_40, %c0_41] : memref<32x128xf32, #tpu.memory_space<vmem>>, vector<32x128xf32>
    tpu.vector_store %arg4[%c0_40, %c0_41], %125 {strides = array<i32>} : memref<32x128xf32, #tpu.memory_space<vmem>>, vector<32x128xf32>,
    return
  }
}

</mosaic_0001>

<bundles_post_ra>
// kernel: tpu_custom_call.1
= control target key start
LH: loop header
LB: loop body
LE: loop exit
PB: predicated region body
PF: predicated region fallthrough
CT: control target
= control target key end

     0   :  { %9 = vsyncpa [#allocation3], 0  ;;  %s1498_s0 = inlined_call_operand.hbm [shape: f32[32,128], index: 0, kind: input, shape index: {}, may-alias: {0,4}]   ;;  %s1499_s1 = inlined_call_operand.hbm [shape: bf16[384,128], index: 1, kind: input, shape index: {}]   ;;  %s1500_s2 = inlined_call_operand.hbm [shape: bf16[384,128], index: 2, kind: input, shape index: {}]   ;;  %s1501_s3 = inlined_call_operand.vmem [shape: f32[8,128], index: 3, kind: input, shape index: {}]   ;;  %s1502_s4 = inlined_call_operand.hbm [shape: f32[32,128], index: 4, kind: output, shape index: {}, may-alias: {0,4}]  }
   0x1   :  { %10 = vsyncpa [#allocation6], 0 }
   0x2   :  { %11 = vsyncpa [#allocation4], 0  ;;  %s1288_s15 = smov [#allocation5]  }
   0x3   :  { %s29_s16 = sshll.u32 %s1288_s15, 4  ;;  %s30_s16 = int_to_ptr.vmem [resolvable:$true] %s29_s16 }
   0x4   :  { %s1210_s17 = scalar_lea.vmem %s30_s16, 3072  ;;  %p1215_p1 = scmp.lt.s32.totalorder %s30_s16, %s30_s16 }
   0x5   :  { %p1211_p0 = scmp.ne.s32.totalorder %s30_s16, %s1210_s17  ;;  %p1216_p2 = scmp.lt.s32.totalorder %s1210_s17, %s1210_s17 }
   0x7   :  { %p1217_p3 = por %p1216_p2, %p1215_p1 }
   0x9   :  { %p1218_p4 = pnand %p1217_p3, %p1211_p0 }
   0xb   :  { %1221 = shalt.err (!%p1218_p4)
}
   0xc   :  { %s1289_s18 = smov 64   ;;  %s1290_s19 = smov 4  }
   0xd   :  { %35 = dma.hbm_to_vmem [thread:$0]  %s1499_s1, 3072, %s30_s16, [#allocation6], %s1289_s18, %s1289_s18, %s1290_s19  }
   0xe   :  { %s1291_s22 = smov [#allocation2]  }
   0xf   :  { %s17_s23 = sshll.u32 %s1291_s22, 4  ;;  %s18_s23 = int_to_ptr.vmem [resolvable:$true] %s17_s23 }
  0x10   :  { %s1230_s24 = scalar_lea.vmem %s18_s23, 512  ;;  %p1235_p6 = scmp.lt.s32.totalorder %s18_s23, %s18_s23 }
  0x11   :  { %p1231_p5 = scmp.ne.s32.totalorder %s18_s23, %s1230_s24  ;;  %p1236_p7 = scmp.lt.s32.totalorder %s1230_s24, %s1230_s24 }
  0x13   :  { %p1237_p8 = por %p1236_p7, %p1235_p6 }
  0x15   :  { %p1238_p9 = pnand %p1237_p8, %p1231_p5 }
  0x17   :  { %1241 = shalt.err (!%p1238_p9)
}
  0x18   :  { %s1292_s25 = smov 128   ;;  %s1293_s26 = smov 8  }
  0x19   :  { %23 = dma.hbm_to_vmem [thread:$0]  %s1498_s0, 512, %s18_s23, [#allocation3], %s1292_s25, %s1292_s25, %s1293_s26  }
  0x1a   :  { %s1294_s1 = smov [#allocation7]  }
  0x1b   :  { %s41_s29 = sshll.u32 %s1294_s1, 4  ;;  %s42_s29 = int_to_ptr.vmem [resolvable:$true] %s41_s29 }
  0x1c   :  { %s1250_s30 = scalar_lea.vmem %s42_s29, 3072  ;;  %p1255_p11 = scmp.lt.s32.totalorder %s42_s29, %s42_s29 }
  0x1d   :  { %p1251_p10 = scmp.ne.s32.totalorder %s42_s29, %s1250_s30  ;;  %p1256_p12 = scmp.lt.s32.totalorder %s1250_s30, %s1250_s30 }
  0x1f   :  { %p1257_p13 = por %p1256_p12, %p1255_p11 }
  0x21   :  { %p1258_p0 = pnand %p1257_p13, %p1251_p10 }
  0x23   :  { %1261 = shalt.err (!%p1258_p0)
}
  0x24   :  { %47 = dma.hbm_to_vmem [thread:$0]  %s1500_s2, 3072, %s42_s29, [#allocation6], %s1289_s18, %s1289_s18, %s1290_s19  }
  0x25   :  { %1282 = dma.done.wait [#allocation3], 512  }
  0x26   :  { %1283 = vsyncadd [#allocation3], 4294966784 }
  0x27   :  { %1284 = dma.done.wait [#allocation6], 6144  }
  0x28   :  { %1285 = vsyncadd [#allocation6], 4294961152  ;;  %v1150_v0 = vld [vmem:[#allocation5 + $0x78] sm:$0xff]   ;;  %v1153_v3 = vld [vmem:[#allocation5 + $0x70] sm:$0xff]   ;;  %v64_v4 = vlaneseq  ;;  %v1295_v35 = vmov 0.0   ;;  %s1296_s0 = smov 16  }
  0x29   :  { %v1151_v1 = vld [vmem:[#allocation5 + $0xb8] sm:$0xff]   ;;  %1023 = vmatprep.subr.bf16.mxu0 %v1150_v0  ;;  %v1154_v5 = vld [vmem:[#allocation5 + $0xb0] sm:$0xff]   ;;  %v1156_v7 = vld [vmem:[#allocation5 + $0x68] sm:$0xff]   ;;  %s1297_s2 = smov 32  }
  0x2a   :  { %v1152_v2 = vld [vmem:[#allocation5 + $0x38] sm:$0xff]   ;;  %1099 = vmatprep.subr.bf16.mxu1 %v1151_v1  ;;  %v1155_v6 = vld [vmem:[#allocation5 + $0x30] sm:$0xff]   ;;  %v1157_v8 = vld [vmem:[#allocation5 + $0xa8] sm:$0xff]   ;;  %v1340_v9 = vshrl.u32 %v64_v4, 7 }
  0x2b   :  { %1024 = vmatpush3.bf16.msra.mxu0 %v1152_v2  ;;  %1100 = vmatpush3.bf16.msra.mxu1 %v1151_v1  ;;  %v1158_v10 = vld [vmem:[#allocation5 + $0x28] sm:$0xff]   ;;  %v1159_v11 = vld [vmem:[#allocation5 + $0x60] sm:$0xff]   ;;  %v1162_v15 = vld [vmem:[#allocation5 + $0x58] sm:$0xff]  }
  0x2c   :  { %1025 = vmatprep.subr.bf16.mxu0 %v1153_v3  ;;  %1101 = vmatprep.subr.bf16.mxu1 %v1154_v5  ;;  %v1160_v12 = vld [vmem:[#allocation5 + $0xa0] sm:$0xff]   ;;  %v66_v14 = vadd.s32 8, %v1340_v9  ;;  %v68_v16 = vadd.s32 24, %v1340_v9  ;;  %v1163_v17 = vld [vmem:[#allocation5 + $0x98] sm:$0xff]   ;;  %v67_v18 = vadd.s32 16, %v1340_v9  ;;  %v73_v19 = vand.u32 15, %v1340_v9 }
  0x2d   :  { %v1161_v13 = vld [vmem:[#allocation5 + $0x20] sm:$0xff]   ;;  %v1164_v20 = vld [vmem:[#allocation5 + $0x18] sm:$0xff]   ;;  %v1165_v22 = vld [vmem:[#allocation5 + $0x50] sm:$0xff]   ;;  %vm159_vm0 = vcmp.lt.s32.totalorder %v1340_v9, 7  ;;  %vm146_vm5 = vcmp.lt.s32.totalorder %v1340_v9, 1 }
  0x2e   :  { %v80_v21 = vand.u32 15, %v66_v14  ;;  %v94_v23 = vand.u32 15, %v68_v16  ;;  %v1166_v24 = vld [vmem:[#allocation5 + $0x90] sm:$0xff]   ;;  %v87_v25 = vand.u32 15, %v67_v18  ;;  %vm1347_vm1 = vcmp.ne.s32.totalorder %v73_v19, 0  ;;  %v1168_v29 = vld [vmem:[#allocation5 + $0x48] sm:$0xff]  }
  0x2f   :  { %1026 = vmatpush3.bf16.msra.mxu0 %v1155_v6  ;;  %1102 = vmatpush3.bf16.msra.mxu1 %v1154_v5  ;;  %v1167_v27 = vld [vmem:[#allocation5 + $0x10] sm:$0xff]   ;;  %v1169_v31 = vld [vmem:[#allocation5 + $0x88] sm:$0xff]   ;;  %v1171_v33 = vld [vmem:[#allocation5 + $0x40] sm:$0xff]   ;;  %v1362_v36 = vsel %vm1347_vm1, 1.0, %v1295_v35 }
  0x30   :  { %1027 = vmatprep.subr.bf16.mxu0 %v1156_v7  ;;  %1103 = vmatprep.subr.bf16.mxu1 %v1157_v8  ;;  %vm1351_vm2 = vcmp.ne.s32.totalorder %v80_v21, 15  ;;  %vm1355_vm3 = vcmp.ne.s32.totalorder %v94_v23, 15  ;;  %vm119_vm4 = vcmp.ne.s32.totalorder %v87_v25, 0  ;;  %v1170_v32 = vld [vmem:[#allocation5 + $0x8] sm:$0xff]   ;;  %v1172_v34 = vld [vmem:[#allocation5 + $0x80] sm:$0xff]   ;;  %v1368_v39 = vld [vmem:[#allocation2 + $0x10] sm:$0xff] }
  0x31   :  { %v1364_v37 = vld [vmem:[#allocation2] sm:$0xff]  ;;  %v1366_v38 = vld [vmem:[#allocation2 + $0x8] sm:$0xff]  ;;  %v1372_v40 = vsel %vm1351_vm2, 1.0, %v1295_v35  ;;  %v1376_v41 = vsel %vm1355_vm3, 1.0, %v1295_v35  ;;  %v1378_v42 = vsel %vm119_vm4, 1.0, %v1295_v35  ;;  %v1385_v47 = vld [vmem:[#allocation2 + $0x18] sm:$0xff] }
  0x32   :  { %v142_v43 = vrot.slane %v1364_v37, 7  ;;  %v143_v44 = vrot.slane %v1366_v38, 7  ;;  %v169_v45 = vpack.c.bf16 %v1366_v38, %v1364_v37  ;;  %v155_v46 = vrot.slane %v1364_v37, 1  ;;  %v1173_v52 = vld [vmem:[#allocation5] sm:$0xff]  }
  0x33   :  { %1028 = vmatpush3.bf16.msra.mxu0 %v1158_v10  ;;  %1104 = vmatpush3.bf16.msra.mxu1 %v1157_v8  ;;  %v156_v48 = vrot.slane %v1366_v38, 1  ;;  %v157_v49 = vrot.slane %v1368_v39, 1  ;;  %v145_v50 = vrot.slane %v1385_v47, 7  ;;  %v158_v51 = vrot.slane %v1385_v47, 1 }
  0x34   :  { %1029 = vmatprep.subr.bf16.mxu0 %v1159_v11  ;;  %1105 = vmatprep.subr.bf16.mxu1 %v1160_v12  ;;  %v149_v53 = vsel %vm146_vm5, %v142_v43, %v143_v44  ;;  %v144_v54 = vrot.slane %v1368_v39, 7  ;;  %v172_v1 = vpack.c.bf16 %v1385_v47, %v1368_v39 }
  0x35   :  { %398 = vmatprep.mubr.bf16.mxu0 %v169_v45  ;;  %v161_v55 = vsel %vm159_vm0, %v156_v48, %v157_v49  ;;  %v162_v56 = vsel %vm159_vm0, %v155_v46, %v156_v48  ;;  %v150_v57 = vsel %vm146_vm5, %v145_v50, %v142_v43  ;;  %v160_v60 = vsel %vm159_vm0, %v157_v49, %v158_v51 }
  0x36   :  { %v165_v58 = vmul.f32 %v1372_v40, %v161_v55  ;;  %v151_v59 = vmul.f32 %v1362_v36, %v150_v57  ;;  %v163_v61 = vsel %vm159_vm0, %v158_v51, %v155_v46  ;;  %v148_v2 = vsel %vm146_vm5, %v143_v44, %v144_v54 }
  0x37   :  { %1030 = vmatpush3.bf16.msra.mxu0 %v1161_v13  ;;  %1106 = vmatpush3.bf16.msra.mxu1 %v1160_v12  ;;  %v167_v0 = vmul.f32 %v1376_v41, %v163_v61  ;;  %v153_v4 = vmul.f32 %v1378_v42, %v148_v2  ;;  %v147_v5 = vsel %vm146_vm5, %v144_v54, %v145_v50 }
  0x38   :  { %1031 = vmatprep.subr.bf16.mxu0 %v1162_v15  ;;  %1107 = vmatprep.subr.bf16.mxu1 %v1163_v17  ;;  %v170_v62 = vpack.c.bf16 %v165_v58, %v162_v56  ;;  %v168_v63 = vpack.c.bf16 %v149_v53, %v151_v59 }
  0x39   :  { %v173_v3 = vpack.c.bf16 %v167_v0, %v160_v60  ;;  %v171_v6 = vpack.c.bf16 %v147_v5, %v153_v4 }
  0x3a   :  { %1115 = vmatprep.mubr.bf16.mxu1 %v170_v62 }
  0x3b   :  { %1032 = vmatpush3.bf16.msra.mxu0 %v1164_v20  ;;  %1108 = vmatpush3.bf16.msra.mxu1 %v1163_v17 }
  0x3c   :  { %1033 = vmatprep.subr.bf16.mxu0 %v1165_v22  ;;  %1109 = vmatprep.subr.bf16.mxu1 %v1166_v24 }
  0x3f   :  { %1034 = vmatpush3.bf16.msra.mxu0 %v1167_v27  ;;  %1110 = vmatpush3.bf16.msra.mxu1 %v1166_v24 }
  0x40   :  { %1035 = vmatprep.subr.bf16.mxu0 %v1168_v29  ;;  %1111 = vmatprep.subr.bf16.mxu1 %v1169_v31 }
  0x43   :  { %1036 = vmatpush3.bf16.msra.mxu0 %v1170_v32  ;;  %1112 = vmatpush3.bf16.msra.mxu1 %v1169_v31 }
  0x44   :  { %1037 = vmatprep.subr.bf16.mxu0 %v1171_v33  ;;  %1113 = vmatprep.subr.bf16.mxu1 %v1172_v34 }
  0x47   :  { %1038 = vmatpush3.bf16.msra.mxu0 %v1173_v52  ;;  %1114 = vmatpush3.bf16.msra.mxu1 %v1172_v34  ;;  %v1419_v52 = vsub.s32 0, %v1340_v9 }
  0x4a   :  { %399 = vmatmul.mubr.bf16.vlgmr.msra.gmra.mxu0 %v168_v63  ;;  %1116 = vmatmul.mubr.bf16.vlgmr.msra.gmra.mxu1 %v173_v3 }
  0x4b   :  { %406 = vmatprep.mubr.bf16.mxu0 %v172_v1 }
  0x52   :  { %407 = vmatmul.mubr.bf16.gmra.mxu0 %v171_v6 }
 0x10a   :  { %v1039_v7 = vpop.f32.mrf.mxu0  ;;  %v1117_v8 = vpop.f32.mrf.mxu1 }
 0x10c   :  { %v1040_v10 = vpop.f32.mrf.mxu0  ;;  %v449_v11 = vpop.f32.mrf.mxu1 }
 0x10d   :  { %v1041_v17 = vadd.f32 %v1040_v10, %v1039_v7 }
 0x10e   :  { %v1042_v12 = vpop.f32.mrf.mxu0  ;;  %v1118_v13 = vpop.f32.mrf.mxu1 }
 0x10f   :  { %v450_v23 = vadd.f32 %v1041_v17, %v449_v11  ;;  %v1177_v17 = vld [vmem:[#allocation7 + $0x70] sm:$0xff]  }
 0x110   :  { %v1043_v14 = vpop.f32.mrf.mxu0  ;;  %v452_v18 = vpop.f32.mrf.mxu1 }
 0x111   :  { %v1044_v15 = vadd.f32 %v1043_v14, %v1042_v12  ;;  %v1174_v14 = vld [vmem:[#allocation7 + $0x78] sm:$0xff]  }
 0x112   :  { %v1045_v16 = vpop.f32.mrf.mxu0  ;;  %1061 = vmatprep.subr.bf16.mxu0 %v1174_v14 }
 0x113   :  { %v453_v20 = vadd.f32 %v1044_v15, %v452_v18  ;;  %v1175_v15 = vld [vmem:[#allocation7 + $0x38] sm:$0xff]   ;;  %v1178_v18 = vld [vmem:[#allocation7 + $0x30] sm:$0xff]  }
 0x114   :  { %v1046_v19 = vpop.f32.mrf.mxu0  ;;  %1062 = vmatpush3.bf16.msra.mxu0 %v1175_v15 }
 0x115   :  { %v1047_v21 = vadd.f32 %v1046_v19, %v1045_v16  ;;  %v464_v26 = vadd.f32 %v453_v20, %v450_v23  ;;  %v1176_v16 = vld [vmem:[#allocation7 + $0xb8] sm:$0xff]   ;;  %v1179_v19 = vld [vmem:[#allocation7 + $0xb0] sm:$0xff]   ;;  %1063 = vmatprep.subr.bf16.mxu0 %v1177_v17 }
 0x116   :  { %v1048_v22 = vpop.f32.mrf.mxu0  ;;  %1119 = vmatprep.subr.bf16.mxu1 %v1176_v16 }
 0x117   :  { %v458_v24 = vadd.f32 %v1117_v8, %v1047_v21  ;;  %1120 = vmatpush3.bf16.msra.mxu1 %v1176_v16 }
 0x118   :  { %v1049_v25 = vpop.f32.mrf.mxu0  ;;  %1064 = vmatpush3.bf16.msra.mxu0 %v1178_v18  ;;  %1121 = vmatprep.subr.bf16.mxu1 %v1179_v19 }
 0x119   :  { %v1050_v27 = vadd.f32 %v1049_v25, %v1048_v22  ;;  %v465_v28 = vadd.f32 %v464_v26, %v458_v24  ;;  %v1180_v22 = vld [vmem:[#allocation7 + $0x68] sm:$0xff]   ;;  %v1183_v25 = vld [vmem:[#allocation7 + $0x60] sm:$0xff]  }
 0x11a   :  { %1065 = vmatprep.subr.bf16.mxu0 %v1180_v22  ;;  %v1184_v26 = vld [vmem:[#allocation7 + $0x20] sm:$0xff]  }
 0x11b   :  { %v461_v29 = vadd.f32 %v1118_v13, %v1050_v27  ;;  %1122 = vmatpush3.bf16.msra.mxu1 %v1179_v19  ;;  %v1185_v27 = vld [vmem:[#allocation7 + $0xa0] sm:$0xff]  }
 0x11d   :  { %v466_v30 = vadd.f32 %v465_v28, %v461_v29  ;;  %v1186_v28 = vld [vmem:[#allocation7 + $0x58] sm:$0xff]  }
 0x11f   :  { %v467_v31 = vrot.slane %v466_v30, 4 }
 0x121   :  { %v468_v32 = vadd.f32 %v467_v31, %v466_v30  ;;  %v1188_v30 = vld [vmem:[#allocation7 + $0x98] sm:$0xff]   ;;  %v1189_v31 = vld [vmem:[#allocation7 + $0x50] sm:$0xff]  }
 0x123   :  { %v469_v33 = vrot.slane %v468_v32, 2 }
 0x125   :  { %v470_v34 = vadd.f32 %v469_v33, %v468_v32  ;;  %v1190_v32 = vld [vmem:[#allocation7 + $0x10] sm:$0xff]  }
 0x126   :  { %v1191_v33 = vld [vmem:[#allocation7 + $0x90] sm:$0xff]  }
 0x127   :  { %v471_v35 = vrot.slane %v470_v34, 1 }
 0x129   :  { %v472_v43 = vadd.f32 %v471_v35, %v470_v34  ;;  %v1192_v34 = vld [vmem:[#allocation7 + $0x48] sm:$0xff]  }
 0x12a   :  { %v1194_v35 = vld [vmem:[#allocation7 + $0x88] sm:$0xff]  }
 0x12b   :  { %473 = vrot.lane.b32.xlu0 %v472_v43, %s1293_s26 }
 0x19d   :  { %v474_v44 = vpop.permute.xlu0 %473 }
 0x19e   :  { %v475_v45 = vadd.f32 %v474_v44, %v472_v43  ;;  %v1193_v43 = vld [vmem:[#allocation7 + $0x8] sm:$0xff]   ;;  %v1195_v44 = vld [vmem:[#allocation7 + $0x40] sm:$0xff]  }
 0x1a0   :  { %476 = vrot.lane.b32.xlu0 %v475_v45, %s1296_s0 }
 0x212   :  { %v477_v46 = vpop.permute.xlu0 %476 }
 0x213   :  { %v478_v48 = vadd.f32 %v477_v46, %v475_v45  ;;  %v1196_v45 = vld [vmem:[#allocation7] sm:$0xff]  }
 0x214   :  { %v1197_v46 = vld [vmem:[#allocation7 + $0x80] sm:$0xff]  }
 0x215   :  { %479 = vrot.lane.b32.xlu1 %v478_v48, %s1297_s2 }
 0x287   :  { %v480_v49 = vpop.permute.xlu1 %479 }
 0x288   :  { %v481_v50 = vadd.f32 %v480_v49, %v478_v48 }
 0x28a   :  { %482 = vrot.lane.b32.xlu1 %v481_v50, %s1289_s18 }
 0x2fc   :  { %v483_v51 = vpop.permute.xlu1 %482 }
 0x2fd   :  { %v484_v53 = vadd.f32 %v483_v51, %v481_v50 }
 0x2ff   :  { %v485_v54 = vmul.f32 0.001953125, %v484_v53  ;;  %v1445_v53 = vld [vmem:[%s1501_s3] sm:$0xff]  ;;  %s1298_s3 = smov [#allocation8]  }
 0x300   :  { %s958_s9 = sshll.u32 %s1298_s3, 4  ;;  %s959_s9 = int_to_ptr.vmem [resolvable:$true] %s958_s9 }
 0x301   :  { %v489_v55 = vrot.slane %v485_v54, %v1419_v52  ;;  %v533_v54 = vsub.s32 1, %v1340_v9  ;;  %s1262_s10 = scalar_lea.vmem %s959_s9, 512  ;;  %p1267_p2 = scmp.lt.s32.totalorder %s959_s9, %s959_s9 }
 0x302   :  { %p1263_p1 = scmp.ne.s32.totalorder %s959_s9, %s1262_s10  ;;  %p1268_p3 = scmp.lt.s32.totalorder %s1262_s10, %s1262_s10 }
 0x303   :  { %v1422_v56 = vsub.f32 %v450_v23, %v489_v55  ;;  %v1424_v57 = vsub.f32 %v453_v20, %v489_v55  ;;  %v1426_v58 = vsub.f32 %v458_v24, %v489_v55  ;;  %v1428_v59 = vsub.f32 %v461_v29, %v489_v55  ;;  %v1181_v23 = vld [vmem:[#allocation7 + $0x28] sm:$0xff]   ;;  %v1187_v29 = vld [vmem:[#allocation7 + $0x18] sm:$0xff]  }
 0x304   :  { %v1182_v24 = vld [vmem:[#allocation7 + $0xa8] sm:$0xff]   ;;  %1066 = vmatpush3.bf16.msra.mxu0 %v1181_v23  ;;  %p1269_p4 = por %p1268_p3, %p1267_p2 }
 0x305   :  { %v494_v60 = vmul.f32 %v1422_v56, %v1422_v56  ;;  %v495_v61 = vmul.f32 %v1424_v57, %v1424_v57  ;;  %v496_v62 = vmul.f32 %v1426_v58, %v1426_v58  ;;  %v497_v0 = vmul.f32 %v1428_v59, %v1428_v59  ;;  %1123 = vmatprep.subr.bf16.mxu1 %v1182_v24 }
 0x306   :  { %1124 = vmatpush3.bf16.msra.mxu1 %v1182_v24  ;;  %1067 = vmatprep.subr.bf16.mxu0 %v1183_v25  ;;  %p1270_p5 = pnand %p1269_p4, %p1263_p1 }
 0x307   :  { %v498_v63 = vadd.f32 %v495_v61, %v494_v60  ;;  %1125 = vmatprep.subr.bf16.mxu1 %v1185_v27 }
 0x308   :  { %1068 = vmatpush3.bf16.msra.mxu0 %v1184_v26 }
 0x309   :  { %v499_v1 = vadd.f32 %v498_v63, %v496_v62  ;;  %1069 = vmatprep.subr.bf16.mxu0 %v1186_v28  ;;  %v534_v62 = vrot.slane %v1445_v53, %v533_v54 }
 0x30a   :  { %1126 = vmatpush3.bf16.msra.mxu1 %v1185_v27 }
 0x30b   :  { %v500_v2 = vadd.f32 %v499_v1, %v497_v0  ;;  %1127 = vmatprep.subr.bf16.mxu1 %v1188_v30 }
 0x30c   :  { %1070 = vmatpush3.bf16.msra.mxu0 %v1187_v29 }
 0x30d   :  { %v501_v3 = vrot.slane %v500_v2, 4  ;;  %1071 = vmatprep.subr.bf16.mxu0 %v1189_v31 }
 0x30e   :  { %1128 = vmatpush3.bf16.msra.mxu1 %v1188_v30 }
 0x30f   :  { %v502_v4 = vadd.f32 %v501_v3, %v500_v2  ;;  %1129 = vmatprep.subr.bf16.mxu1 %v1191_v33 }
 0x310   :  { %1072 = vmatpush3.bf16.msra.mxu0 %v1190_v32 }
 0x311   :  { %v503_v5 = vrot.slane %v502_v4, 2  ;;  %1073 = vmatprep.subr.bf16.mxu0 %v1192_v34 }
 0x312   :  { %1130 = vmatpush3.bf16.msra.mxu1 %v1191_v33 }
 0x313   :  { %v504_v6 = vadd.f32 %v503_v5, %v502_v4  ;;  %1131 = vmatprep.subr.bf16.mxu1 %v1194_v35 }
 0x314   :  { %1074 = vmatpush3.bf16.msra.mxu0 %v1193_v43 }
 0x315   :  { %v505_v7 = vrot.slane %v504_v6, 1  ;;  %1075 = vmatprep.subr.bf16.mxu0 %v1195_v44 }
 0x316   :  { %1132 = vmatpush3.bf16.msra.mxu1 %v1194_v35 }
 0x317   :  { %v506_v8 = vadd.f32 %v505_v7, %v504_v6  ;;  %1133 = vmatprep.subr.bf16.mxu1 %v1197_v46 }
 0x318   :  { %1076 = vmatpush3.bf16.msra.mxu0 %v1196_v45 }
 0x319   :  { %507 = vrot.lane.b32.xlu0 %v506_v8, %s1293_s26 }
 0x31a   :  { %1134 = vmatpush3.bf16.msra.mxu1 %v1197_v46 }
 0x38b   :  { %v508_v10 = vpop.permute.xlu0 %507 }
 0x38c   :  { %v509_v11 = vadd.f32 %v508_v10, %v506_v8 }
 0x38e   :  { %510 = vrot.lane.b32.xlu1 %v509_v11, %s1296_s0 }
 0x400   :  { %v511_v12 = vpop.permute.xlu1 %510 }
 0x401   :  { %v512_v13 = vadd.f32 %v511_v12, %v509_v11 }
 0x403   :  { %513 = vrot.lane.b32.xlu0 %v512_v13, %s1297_s2 }
 0x475   :  { %v514_v20 = vpop.permute.xlu0 %513 }
 0x476   :  { %v515_v21 = vadd.f32 %v514_v20, %v512_v13 }
 0x478   :  { %516 = vrot.lane.b32.xlu1 %v515_v21, %s1289_s18 }
 0x4ea   :  { %v517_v48 = vpop.permute.xlu1 %516 }
 0x4eb   :  { %v518_v49 = vadd.f32 %v517_v48, %v515_v21 }
 0x4ed   :  { %v519_v50 = vmul.f32 0.001953125, %v518_v49 }
 0x4ef   :  { %v520_v51 = vadd.f32 1e-05, %v519_v50 }
 0x4f1   :  { %1198 = vrsqrt.f32 %v520_v51 }
 0x4fe   :  { %v1199_v55 = vpop.eup %1198 }
 0x4ff   :  { %v522_v60 = vmul.f32 %v1199_v55, %v1445_v53 }
 0x501   :  { %v526_v61 = vrot.slane %v522_v60, %v1419_v52 }
 0x503   :  { %v530_v63 = vmul.f32 %v526_v61, %v1428_v59  ;;  %v527_v0 = vmul.f32 %v526_v61, %v1422_v56  ;;  %v528_v1 = vmul.f32 %v526_v61, %v1424_v57  ;;  %v529_v2 = vmul.f32 %v526_v61, %v1426_v58 }
 0x505   :  { %v535_v3 = vadd.f32 %v534_v62, %v527_v0  ;;  %v536_v4 = vadd.f32 %v534_v62, %v528_v1  ;;  %v538_v5 = vadd.f32 %v534_v62, %v530_v63  ;;  %v537_v6 = vadd.f32 %v534_v62, %v529_v2 }
 0x507   :  { %v539_v7 = vmax.f32 %v535_v3, 0.0  ;;  %v540_v8 = vmax.f32 %v536_v4, 0.0  ;;  %v542_v10 = vmax.f32 %v538_v5, 0.0  ;;  %v541_v11 = vmax.f32 %v537_v6, 0.0 }
 0x509   :  { %v543_v12 = vrot.slane %v539_v7, 7  ;;  %v544_v13 = vrot.slane %v540_v8, 7  ;;  %v568_v14 = vpack.c.bf16 %v540_v8, %v539_v7  ;;  %v546_v15 = vrot.slane %v542_v10, 7 }
 0x50a   :  { %v555_v16 = vrot.slane %v539_v7, 1  ;;  %v556_v59 = vrot.slane %v540_v8, 1  ;;  %v557_v17 = vrot.slane %v541_v11, 1  ;;  %v558_v57 = vrot.slane %v542_v10, 1 }
 0x50b   :  { %797 = vmatprep.mubr.bf16.mxu0 %v568_v14  ;;  %v550_v56 = vsel %vm146_vm5, %v546_v15, %v543_v12  ;;  %v545_v58 = vrot.slane %v541_v11, 7  ;;  %v549_v20 = vsel %vm146_vm5, %v543_v12, %v544_v13  ;;  %v571_v27 = vpack.c.bf16 %v542_v10, %v541_v11 }
 0x50c   :  { %v551_v18 = vmul.f32 %v1362_v36, %v550_v56  ;;  %v560_v19 = vsel %vm159_vm0, %v556_v59, %v557_v17  ;;  %v562_v22 = vsel %vm159_vm0, %v558_v57, %v555_v16  ;;  %v561_v24 = vsel %vm159_vm0, %v555_v16, %v556_v59 }
 0x50d   :  { %v564_v21 = vmul.f32 %v1372_v40, %v560_v19  ;;  %v566_v25 = vmul.f32 %v1376_v41, %v562_v22  ;;  %v559_v36 = vsel %vm159_vm0, %v557_v17, %v558_v57  ;;  %v548_v28 = vsel %vm146_vm5, %v544_v13, %v545_v58 }
 0x50e   :  { %v567_v23 = vpack.c.bf16 %v549_v20, %v551_v18  ;;  %v553_v40 = vmul.f32 %v1378_v42, %v548_v28  ;;  %v547_v30 = vsel %vm146_vm5, %v545_v58, %v546_v15 }
 0x50f   :  { %v569_v26 = vpack.c.bf16 %v564_v21, %v561_v24  ;;  %v572_v29 = vpack.c.bf16 %v566_v25, %v559_v36 }
 0x510   :  { %798 = vmatmul.mubr.bf16.vlgmr.msra.gmra.mxu0 %v567_v23  ;;  %v570_v31 = vpack.c.bf16 %v547_v30, %v553_v40 }
 0x511   :  { %1135 = vmatprep.mubr.bf16.mxu1 %v569_v26  ;;  %805 = vmatprep.mubr.bf16.mxu0 %v571_v27 }
 0x512   :  { %1136 = vmatmul.mubr.bf16.vlgmr.msra.gmra.mxu1 %v572_v29 }
 0x518   :  { %806 = vmatmul.mubr.bf16.gmra.mxu0 %v570_v31 }
 0x5d0   :  { %v1077_v41 = vpop.f32.mrf.mxu0 }
 0x5d2   :  { %v1137_v32 = vpop.f32.mrf.mxu1  ;;  %v1078_v33 = vpop.f32.mrf.mxu0 }
 0x5d3   :  { %v1079_v49 = vadd.f32 %v1078_v33, %v1077_v41 }
 0x5d4   :  { %v848_v34 = vpop.f32.mrf.mxu1  ;;  %v1080_v35 = vpop.f32.mrf.mxu0 }
 0x5d5   :  { %v849_v55 = vadd.f32 %v1079_v49, %v848_v34  ;;  %v935_v49 = vsub.s32 3, %v1340_v9 }
 0x5d6   :  { %v1138_v43 = vpop.f32.mrf.mxu1  ;;  %v1081_v44 = vpop.f32.mrf.mxu0 }
 0x5d7   :  { %v1082_v45 = vadd.f32 %v1081_v44, %v1080_v35 }
 0x5d8   :  { %v851_v46 = vpop.f32.mrf.mxu1  ;;  %v1083_v48 = vpop.f32.mrf.mxu0 }
 0x5d9   :  { %v852_v51 = vadd.f32 %v1082_v45, %v851_v46 }
 0x5da   :  { %v1084_v50 = vpop.f32.mrf.mxu0 }
 0x5db   :  { %v1085_v54 = vadd.f32 %v1084_v50, %v1083_v48  ;;  %v863_v62 = vadd.f32 %v852_v51, %v849_v55  ;;  %v922_v48 = vrot.slane %v1445_v53, 2 }
 0x5dc   :  { %v1086_v42 = vpop.f32.mrf.mxu0 }
 0x5dd   :  { %v857_v60 = vadd.f32 %v1137_v32, %v1085_v54 }
 0x5de   :  { %v1087_v61 = vpop.f32.mrf.mxu0 }
 0x5df   :  { %v1088_v63 = vadd.f32 %v1087_v61, %v1086_v42  ;;  %v864_v0 = vadd.f32 %v863_v62, %v857_v60  ;;  %v936_v42 = vrot.slane %v1445_v53, %v935_v49 }
 0x5e1   :  { %v860_v1 = vadd.f32 %v1138_v43, %v1088_v63 }
 0x5e3   :  { %v865_v2 = vadd.f32 %v864_v0, %v860_v1 }
 0x5e5   :  { %v866_v3 = vrot.slane %v865_v2, 4 }
 0x5e7   :  { %v867_v4 = vadd.f32 %v866_v3, %v865_v2 }
 0x5e9   :  { %v868_v5 = vrot.slane %v867_v4, 2 }
 0x5eb   :  { %v869_v6 = vadd.f32 %v868_v5, %v867_v4 }
 0x5ed   :  { %v870_v7 = vrot.slane %v869_v6, 1 }
 0x5ef   :  { %v871_v8 = vadd.f32 %v870_v7, %v869_v6 }
 0x5f1   :  { %872 = vrot.lane.b32.xlu0 %v871_v8, %s1293_s26 }
 0x663   :  { %v873_v10 = vpop.permute.xlu0 %872 }
 0x664   :  { %v874_v11 = vadd.f32 %v873_v10, %v871_v8 }
 0x666   :  { %875 = vrot.lane.b32.xlu1 %v874_v11, %s1296_s0 }
 0x6d8   :  { %v876_v12 = vpop.permute.xlu1 %875 }
 0x6d9   :  { %v877_v13 = vadd.f32 %v876_v12, %v874_v11 }
 0x6db   :  { %878 = vrot.lane.b32.xlu0 %v877_v13, %s1297_s2 }
 0x74d   :  { %v879_v14 = vpop.permute.xlu0 %878 }
 0x74e   :  { %v880_v15 = vadd.f32 %v879_v14, %v877_v13 }
 0x750   :  { %881 = vrot.lane.b32.xlu1 %v880_v15, %s1289_s18 }
 0x7c2   :  { %v882_v16 = vpop.permute.xlu1 %881 }
 0x7c3   :  { %v883_v59 = vadd.f32 %v882_v16, %v880_v15 }
 0x7c5   :  { %v884_v17 = vmul.f32 0.001953125, %v883_v59 }
 0x7c7   :  { %v888_v56 = vrot.slane %v884_v17, %v1419_v52 }
 0x7c9   :  { %v889_v57 = vsub.f32 %v849_v55, %v888_v56  ;;  %v890_v58 = vsub.f32 %v852_v51, %v888_v56  ;;  %v891_v18 = vsub.f32 %v857_v60, %v888_v56  ;;  %v892_v19 = vsub.f32 %v860_v1, %v888_v56 }
 0x7cb   :  { %v893_v20 = vmul.f32 %v889_v57, %v889_v57  ;;  %v894_v21 = vmul.f32 %v890_v58, %v890_v58  ;;  %v895_v22 = vmul.f32 %v891_v18, %v891_v18  ;;  %v896_v24 = vmul.f32 %v892_v19, %v892_v19 }
 0x7cd   :  { %v897_v23 = vadd.f32 %v894_v21, %v893_v20 }
 0x7cf   :  { %v898_v25 = vadd.f32 %v897_v23, %v895_v22 }
 0x7d1   :  { %v899_v26 = vadd.f32 %v898_v25, %v896_v24 }
 0x7d3   :  { %v900_v27 = vrot.slane %v899_v26, 4 }
 0x7d5   :  { %v901_v36 = vadd.f32 %v900_v27, %v899_v26 }
 0x7d7   :  { %v902_v28 = vrot.slane %v901_v36, 2 }
 0x7d9   :  { %v903_v29 = vadd.f32 %v902_v28, %v901_v36 }
 0x7db   :  { %v904_v40 = vrot.slane %v903_v29, 1 }
 0x7dd   :  { %v905_v30 = vadd.f32 %v904_v40, %v903_v29 }
 0x7df   :  { %906 = vrot.lane.b32.xlu0 %v905_v30, %s1293_s26 }
 0x851   :  { %v907_v31 = vpop.permute.xlu0 %906 }
 0x852   :  { %v908_v41 = vadd.f32 %v907_v31, %v905_v30 }
 0x854   :  { %909 = vrot.lane.b32.xlu1 %v908_v41, %s1296_s0 }
 0x8c6   :  { %v910_v32 = vpop.permute.xlu1 %909 }
 0x8c7   :  { %v911_v33 = vadd.f32 %v910_v32, %v908_v41 }
 0x8c9   :  { %912 = vrot.lane.b32.xlu0 %v911_v33, %s1297_s2 }
 0x93b   :  { %v913_v34 = vpop.permute.xlu0 %912 }
 0x93c   :  { %v914_v35 = vadd.f32 %v913_v34, %v911_v33 }
 0x93e   :  { %915 = vrot.lane.b32.xlu1 %v914_v35, %s1289_s18 }
 0x9b0   :  { %v916_v43 = vpop.permute.xlu1 %915 }
 0x9b1   :  { %v917_v44 = vadd.f32 %v916_v43, %v914_v35 }
 0x9b3   :  { %v918_v45 = vmul.f32 0.001953125, %v917_v44 }
 0x9b5   :  { %v919_v46 = vadd.f32 1e-05, %v918_v45 }
 0x9b7   :  { %1200 = vrsqrt.f32 %v919_v46 }
 0x9c4   :  { %v1201_v50 = vpop.eup %1200 }
 0x9c5   :  { %v924_v51 = vmul.f32 %v1201_v50, %v922_v48 }
 0x9c7   :  { %v928_v54 = vrot.slane %v924_v51, %v1419_v52 }
 0x9c9   :  { %v929_v55 = vmul.f32 %v928_v54, %v889_v57  ;;  %v930_v60 = vmul.f32 %v928_v54, %v890_v58  ;;  %v931_v61 = vmul.f32 %v928_v54, %v891_v18  ;;  %v932_v62 = vmul.f32 %v928_v54, %v892_v19 }
 0x9cb   :  { %v937_v63 = vadd.f32 %v936_v42, %v929_v55  ;;  %v938_v0 = vadd.f32 %v936_v42, %v930_v60  ;;  %v939_v1 = vadd.f32 %v936_v42, %v931_v61  ;;  %v940_v2 = vadd.f32 %v936_v42, %v932_v62 }
 0x9cd   :  { %v941_v3 = vmax.f32 %v937_v63, 0.0  ;;  %v942_v4 = vmax.f32 %v938_v0, 0.0  ;;  %v943_v5 = vmax.f32 %v939_v1, 0.0  ;;  %v944_v9 = vmax.f32 %v940_v2, 0.0 }
 0x9cf   :  { %v945_v6 = vadd.f32 %v941_v3, %v1364_v37  ;;  %v946_v52 = vadd.f32 %v942_v4, %v1366_v38  ;;  %v947_v53 = vadd.f32 %v943_v5, %v1368_v39  ;;  %v948_v7 = vadd.f32 %v944_v9, %v1385_v47 }
 0x9d1   :  { %949 = vst [vmem:[#allocation8] sm:$0xff] %v945_v6  ;;  %950 = vst [vmem:[#allocation8 + $0x8] sm:$0xff] %v946_v52 }
 0x9d2   :  { %951 = vst [vmem:[#allocation8 + $0x10] sm:$0xff] %v947_v53  ;;  %952 = vst [vmem:[#allocation8 + $0x18] sm:$0xff] %v948_v7 }
 0x9d3   :  { %1273 = shalt.err (!%p1270_p5)
}
 0x9d4   :  { %964 = dma.vmem_to_hbm [thread:$0]  %s959_s9, 512, %s1502_s4, [#allocation4], %s1292_s25, %s1292_s25, %s1293_s26  }
 0x9d5   :  { %1286 = dma.done.wait [#allocation4], 512  }
 0x9d6   :  { %1287 = vsyncadd [#allocation4], 4294966784 }
 0x9d7   :  { %968 = vsyncpa [#allocation3], 1 }
 0x9d8   :  { %969 = vsyncpa [#allocation6], 1 }
 0x9d9   :  { %970 = vsyncpa [#allocation4], 1 }

</bundles_post_ra>
